<compile_context>
chip_gen: v7x
topology: tpu7x:2x2x1
jax: 0.10.0
libtpu: 0.0.40
codegen_flags: <defaults>
</compile_context>

<pallas_src>
import functools

import numpy as np
import jax
import jax.numpy as jnp
from jax.experimental import pallas as pl
from jax.experimental.pallas import tpu as pltpu

# Memory-space enum (new name, with fallback for slightly older jax).
_MS = getattr(pltpu, "MemorySpace", None) or getattr(pltpu, "TPUMemorySpace")
_VMEM_SPACE = _MS.VMEM


def _round_up(x, m):
    return ((x + m - 1) // m) * m


def _vmem_capacity_bytes():
    """Physical per-core VMEM; conservative 64 MiB (v7x) if the query fails."""
    try:
        return int(pltpu.get_tpu_info().vmem_capacity_bytes)
    except Exception:
        return 64 * 1024 * 1024


def _plan_tiles(M, K, dim, x_isz, o_isz, w_isz, tm=None, tm_max=4096):
    """Row tile + VMEM limit derived from the actual generation's VMEM size."""
    cap = _vmem_capacity_bytes()
    Kp = _round_up(K, 128)                 # lane padding of the (tm, K) block
    Dp = _round_up(dim, 128)
    # Single-buffered VMEM residents: weight (K, dim) + params (3, dim) f32.
    resident = _round_up(K, 8) * Dp * w_isz + 8 * Dp * 4
    # Streaming (double-buffered) bytes per activation/output row.
    stream_per_row = 2 * (Kp * x_isz + Dp * o_isz)
    if tm is None:
        budget = max(int(0.45 * cap) - resident, 2 * 1024 * 1024)
        tm = max(8, min(tm_max, (budget // stream_per_row) // 8 * 8))
        if M >= 16:                        # >= 2 row blocks so both v7x TCs work
            tm = min(tm, _round_up(pl.cdiv(M, 2), 8))
    tm = max(8, min(tm, _round_up(M, 8)))
    vmem_need = resident + tm * stream_per_row
    vmem_limit = int(min(int(0.85 * cap),
                         max(int(1.3 * vmem_need) + (2 << 20), 16 << 20)))
    return tm, vmem_limit


def _audio_pack_kernel(x_ref, w_ref, p_ref, o_ref, *, eps, layernorm, inv_dim):
    """One row tile: y = x @ W + b, optional LayerNorm.  All math in f32.

    x_ref: (tm, K) activation rows (compute dtype, streamed)
    w_ref: (K, dim) VMEM-resident weight (compute dtype)
    p_ref: (3, dim) f32 packed [bias; gamma; beta] (VMEM resident)
    o_ref: (tm, dim) lane-dense output tile
    """
    y = jnp.dot(x_ref[...], w_ref[...], preferred_element_type=jnp.float32)
    y = y + p_ref[0:1, :]
    if layernorm:
        mean = jnp.sum(y, axis=-1, keepdims=True) * inv_dim
        c = y - mean
        var = jnp.sum(c * c, axis=-1, keepdims=True) * inv_dim   # two-pass: stable
        inv_std = jax.lax.rsqrt(var + eps)                        # EUP slot (free-ish)
        y = (c * inv_std) * p_ref[1:2, :] + p_ref[2:3, :]
    o_ref[...] = y.astype(o_ref.dtype)


def audio_pack_forward(vid, weight, bias, gamma=None, beta=None,
                       patch_size=(1, 1, 1), *, layernorm=False, eps=1e-5,
                       compute_dtype=None, out_dtype=None, tm=None):
    """vid: [B, C, T*t, H*h, W*w] (NCDHW); weight: [dim, C*t*h*w] (nn.Linear layout);
    bias/gamma/beta: [dim].  Returns [B, T, H, W, dim].

    compute_dtype: dtype of the streamed activations/weight and the MXU inputs
      (accumulation + LayerNorm stay f32).  bf16 roughly halves HBM traffic of
      this memory-bound op.  Default None -> vid.dtype (exact module semantics).
    out_dtype: output dtype (default vid.dtype).
    """
    t, h, w = patch_size
    B, C, Tt, Hh, Ww = vid.shape
    T, H, W = Tt // t, Hh // h, Ww // w
    dim = weight.shape[0]
    K = C * t * h * w
    M = B * T * H * W

    cdt = np.dtype(compute_dtype) if compute_dtype is not None else vid.dtype
    odt = np.dtype(out_dtype) if out_dtype is not None else vid.dtype

    # ---- trace-time glue ----------------------------------------------------
    # Weight permuted from the nn.Linear (t h w c) feature order to (c t h w),
    # so the activation transpose below keeps contiguous innermost w-runs.
    w_kn = jnp.transpose(weight.reshape(dim, t, h, w, C), (4, 1, 2, 3, 0))
    w_kn = w_kn.reshape(K, dim).astype(cdt)

    if gamma is None:
        gamma = jnp.ones((dim,), jnp.float32)
    if beta is None:
        beta = jnp.zeros((dim,), jnp.float32)
    params = jnp.stack([bias.astype(jnp.float32),
                        gamma.astype(jnp.float32),
                        beta.astype(jnp.float32)], axis=0)          # (3, dim) f32

    # Patchify rearrange: 'b c (T t) (H h) (W w) -> (b T H W) (c t h w)'.
    # Single XLA pass; the compute-dtype cast happens first so the relayout
    # moves the narrow dtype.
    # TODO(synk): fuse this de-interleave into the kernel's DMA read path.
    x = vid.astype(cdt) if cdt != vid.dtype else vid
    x = x.reshape(B, C, T, t, H, h, W, w)
    x = jnp.transpose(x, (0, 2, 4, 6, 1, 3, 5, 7))                  # b T H W c t h w
    x2d = x.reshape(M, K)

    # ---- tiling / VMEM plan -------------------------------------------------
    tm, vmem_limit = _plan_tiles(M, K, dim, cdt.itemsize, odt.itemsize,
                                 cdt.itemsize, tm=tm)
    grid_m = pl.cdiv(M, tm)      # ragged tail handled by Pallas (no pad / slice)

    cost = pl.CostEstimate(
        flops=2 * M * K * dim,
        bytes_accessed=(M * K + K * dim) * cdt.itemsize
                       + M * dim * odt.itemsize + 3 * dim * 4,
        transcendentals=M if layernorm else 0)

    kernel = functools.partial(_audio_pack_kernel, eps=float(eps),
                               layernorm=bool(layernorm),
                               inv_dim=1.0 / float(dim))

    out2d = pl.pallas_call(
        kernel,
        out_shape=jax.ShapeDtypeStruct((M, dim), odt),
        grid=(grid_m,),
        in_specs=[
            pl.BlockSpec((tm, K), lambda i: (i, 0)),                # streamed rows
            pl.BlockSpec(memory_space=_VMEM_SPACE),                 # resident weight
            pl.BlockSpec(memory_space=_VMEM_SPACE),                 # resident params
        ],
        out_specs=pl.BlockSpec((tm, dim), lambda i: (i, 0)),        # lane-dense out
        compiler_params=pltpu.CompilerParams(
            dimension_semantics=("parallel",),
            vmem_limit_bytes=vmem_limit),
        cost_estimate=cost,
    )(x2d, w_kn, params)

    return out2d.reshape(B, T, H, W, dim)


def _reference(vid, weight, bias, gamma, beta, patch_size, layernorm=True, eps=1e-5):
    t, h, w = patch_size
    B, C, Tt, Hh, Ww = vid.shape
    T, H, W = Tt // t, Hh // h, Ww // w
    x = vid.reshape(B, C, T, t, H, h, W, w)
    x = jnp.transpose(x, (0, 2, 4, 6, 3, 5, 7, 1)).reshape(B, T, H, W, -1)
    y = x @ weight.T + bias
    if layernorm:
        mu = jnp.mean(y, axis=-1, keepdims=True)
        var = jnp.mean((y - mu) ** 2, axis=-1, keepdims=True)
        y = (y - mu) * jax.lax.rsqrt(var + eps) * gamma + beta
    return y


if __name__ == "__main__":
    key = jax.random.PRNGKey(0)
    k_vid, k_w, k_b, k_g, k_bt = jax.random.split(key, 5)

    # Small shapes consistent with the module.
    B, C = 2, 4
    patch_size = (1, 2, 2)       # (t, h, w)
    T, H, W = 4, 4, 4
    dim = 128                    # lane-dense output slab
    t, h, w = patch_size
    K = C * t * h * w            # 16

    vid = jax.random.normal(k_vid, (B, C, T * t, H * h, W * w), dtype=jnp.float32)
    weight = jax.random.normal(k_w, (dim, K), dtype=jnp.float32) * 0.1
    bias = jax.random.normal(k_b, (dim,), dtype=jnp.float32) * 0.1
    gamma = 1.0 + 0.1 * jax.random.normal(k_g, (dim,), dtype=jnp.float32)
    beta = 0.1 * jax.random.normal(k_bt, (dim,), dtype=jnp.float32)

    # 1) Exact-semantics path (f32 streaming), LayerNorm on.
    fwd = jax.jit(functools.partial(audio_pack_forward, patch_size=patch_size,
                                    layernorm=True))
    out = jax.block_until_ready(fwd(vid, weight, bias, gamma, beta))
    ref = _reference(vid, weight, bias, gamma, beta, patch_size, layernorm=True)
    assert out.shape == (B, T, H, W, dim)
    assert jnp.allclose(out, ref, atol=1e-3, rtol=1e-3), \
        float(jnp.max(jnp.abs(out - ref)))

    # 2) Projection-only path (layernorm=False branch).
    fwd_nl = jax.jit(functools.partial(audio_pack_forward, patch_size=patch_size,
                                       layernorm=False))
    out_nl = jax.block_until_ready(fwd_nl(vid, weight, bias))
    ref_nl = _reference(vid, weight, bias, gamma, beta, patch_size, layernorm=False)
    assert jnp.allclose(out_nl, ref_nl, atol=1e-3, rtol=1e-3), \
        float(jnp.max(jnp.abs(out_nl - ref_nl)))

    # 3) bf16 streaming / MXU path (memory-bound win; accumulation + LN in f32).
    fwd_bf16 = jax.jit(functools.partial(audio_pack_forward, patch_size=patch_size,
                                         layernorm=True,
                                         compute_dtype=jnp.bfloat16))
    out_bf16 = jax.block_until_ready(fwd_bf16(vid, weight, bias, gamma, beta))
    assert jnp.allclose(out_bf16, ref, atol=7.5e-2, rtol=5e-2), \
        float(jnp.max(jnp.abs(out_bf16 - ref)))

    print("KERNEL_OK")
</pallas_src>

<mosaic_0001>
module attributes {stable_mosaic.version = 11 : i64} {
  func.func @_audio_pack_kernel(%arg0: i32, %arg1: memref<64x16xf32, #tpu.memory_space<vmem>>, %arg2: memref<16x128xf32, #tpu.memory_space<vmem>>, %arg3: memref<3x128xf32, #tpu.memory_space<vmem>>, %arg4: memref<64x128xf32, #tpu.memory_space<vmem>>) attributes {dimension_semantics = [#tpu.dimension_semantics<parallel>], iteration_bounds = array<i64: 2>, scalar_prefetch = 0 : i64, scratch_operands = 0 : i64, tpu.core_type = #tpu.core_type<tc>, window_params = [{transform_indices = @transform_0, window_bounds = array<i64: 64, 16>}, {pipeline_mode = #tpu.pipeline_mode<synchronous>, transform_indices = @transform_1, window_bounds = array<i64: 16, 128>}, {pipeline_mode = #tpu.pipeline_mode<synchronous>, transform_indices = @transform_2, window_bounds = array<i64: 3, 128>}, {transform_indices = @transform_3, window_bounds = array<i64: 64, 128>}]} {
    %c0 = arith.constant 0 : index
    %c0_0 = arith.constant 0 : index
    %0 = vector.load %arg1[%c0, %c0_0] : memref<64x16xf32, #tpu.memory_space<vmem>>, vector<64x16xf32>
    %c0_1 = arith.constant 0 : index
    %c0_2 = arith.constant 0 : index
    %1 = vector.load %arg2[%c0_1, %c0_2] : memref<16x128xf32, #tpu.memory_space<vmem>>, vector<16x128xf32>
    %cst = arith.constant dense<0.000000e+00> : vector<64x128xf32>
    %2 = tpu.matmul %0, %1, %cst {dimension_numbers = #tpu.dot_dimension_numbers<[1], [0], [0], [1], [0, 0, 1, 1], [], []>} : vector<64x16xf32>, vector<16x128xf32>, vector<64x128xf32> -> vector<64x128xf32>
    %c0_3 = arith.constant 0 : index
    %c0_4 = arith.constant 0 : index
    %3 = vector.load %arg3[%c0_3, %c0_4] : memref<3x128xf32, #tpu.memory_space<vmem>>, vector<1x128xf32>
    %4 = vector.broadcast %3 : vector<1x128xf32> to vector<64x128xf32>
    %5 = arith.addf %2, %4 : vector<64x128xf32>
    %cst_5 = arith.constant dense<0.000000e+00> : vector<64xf32>
    %6 = vector.multi_reduction <add>, %5, %cst_5 [1] : vector<64x128xf32> to vector<64xf32>
    %7 = vector.shape_cast %6 : vector<64xf32> to vector<64x1xf32>
    %cst_6 = arith.constant 7.812500e-03 : f32
    %8 = vector.broadcast %cst_6 : f32 to vector<64x1xf32>
    %9 = arith.mulf %7, %8 : vector<64x1xf32>
    %10 = vector.broadcast %9 : vector<64x1xf32> to vector<64x128xf32>
    %11 = arith.subf %5, %10 : vector<64x128xf32>
    %12 = arith.mulf %11, %11 : vector<64x128xf32>
    %cst_7 = arith.constant dense<0.000000e+00> : vector<64xf32>
    %13 = vector.multi_reduction <add>, %12, %cst_7 [1] : vector<64x128xf32> to vector<64xf32>
    %14 = vector.shape_cast %13 : vector<64xf32> to vector<64x1xf32>
    %cst_8 = arith.constant 7.812500e-03 : f32
    %15 = vector.broadcast %cst_8 : f32 to vector<64x1xf32>
    %16 = arith.mulf %14, %15 : vector<64x1xf32>
    %cst_9 = arith.constant 9.99999974E-6 : f32
    %17 = vector.broadcast %cst_9 : f32 to vector<64x1xf32>
    %18 = arith.addf %16, %17 : vector<64x1xf32>
    %19 = math.rsqrt %18 : vector<64x1xf32>
    %20 = vector.broadcast %19 : vector<64x1xf32> to vector<64x128xf32>
    %21 = arith.mulf %11, %20 : vector<64x128xf32>
    %c1 = arith.constant 1 : index
    %c0_10 = arith.constant 0 : index
    %22 = vector.load %arg3[%c1, %c0_10] : memref<3x128xf32, #tpu.memory_space<vmem>>, vector<1x128xf32>
    %23 = vector.broadcast %22 : vector<1x128xf32> to vector<64x128xf32>
    %24 = arith.mulf %21, %23 : vector<64x128xf32>
    %c2 = arith.constant 2 : index
    %c0_11 = arith.constant 0 : index
    %25 = vector.load %arg3[%c2, %c0_11] : memref<3x128xf32, #tpu.memory_space<vmem>>, vector<1x128xf32>
    %26 = vector.broadcast %25 : vector<1x128xf32> to vector<64x128xf32>
    %27 = arith.addf %24, %26 : vector<64x128xf32>
    %c0_12 = arith.constant 0 : index
    %c0_13 = arith.constant 0 : index
    %28 = vector.load %arg4[%c0_12, %c0_13] : memref<64x128xf32, #tpu.memory_space<vmem>>, vector<64x128xf32>
    tpu.vector_store %arg4[%c0_12, %c0_13], %27 {strides = array<i32>} : memref<64x128xf32, #tpu.memory_space<vmem>>, vector<64x128xf32>,
    return
  }
  func.func @transform_0(%arg0: i32) -> (i32, i32) {
    %c0_i32 = arith.constant 0 : i32
    %c0_i32_0 = arith.constant 0 : i32
    return %arg0, %c0_i32 : i32, i32
  }
  func.func @transform_1(%arg0: i32) -> (i32, i32) {
    %c0_i32 = arith.constant 0 : i32
    %c0_i32_0 = arith.constant 0 : i32
    %c0_i32_1 = arith.constant 0 : i32
    return %c0_i32, %c0_i32_0 : i32, i32
  }
  func.func @transform_2(%arg0: i32) -> (i32, i32) {
    %c0_i32 = arith.constant 0 : i32
    %c0_i32_0 = arith.constant 0 : i32
    %c0_i32_1 = arith.constant 0 : i32
    return %c0_i32, %c0_i32_0 : i32, i32
  }
  func.func @transform_3(%arg0: i32) -> (i32, i32) {
    %c0_i32 = arith.constant 0 : i32
    %c0_i32_0 = arith.constant 0 : i32
    return %arg0, %c0_i32 : i32, i32
  }
}

</mosaic_0001>

<bundles_post_ra>
// kernel: audio_pack_forward.1
= control target key start
LH: loop header
LB: loop body
LE: loop exit
PB: predicated region body
PF: predicated region fallthrough
CT: control target
= control target key end

     0   :  { %8 = vsyncpa [#allocation3], 0  ;;  %s895_s0 = inlined_call_operand.vmem [shape: f32[128,16], index: 0, kind: input, shape index: {}]   ;;  %s896_s1 = inlined_call_operand.vmem [shape: f32[16,128], index: 1, kind: input, shape index: {}]   ;;  %s897_s2 = inlined_call_operand.vmem [shape: f32[3,128], index: 2, kind: input, shape index: {}]   ;;  %s898_s3 = inlined_call_operand.hbm [shape: f32[128,128], index: 3, kind: output, shape index: {}]  }
   0x1   :  { %10 = vsyncpa [#allocation3 + $0x1], 0  ;;  %s715_s12 = smov 0   ;;  %s717_s13 = smov 0  }
   0x2   :  { %s719_s14 = smov 0   ;;  %s721_s15 = smov 0  }
   0x3 LB: > { %s736_s16 = sadd.s32 4294967295, %s690_s15   ;;  %s515_s17 = sadd.s32 4294967294, %s690_s15   ;;  %s690_s15 = sphi %s721_s15, %s904_s15   ;;  %s686_s14 = sphi %s719_s14, %s903_s14   ;;  %s682_s13 = sphi %s717_s13, %s902_s13   ;;  %s678_s12 = sphi %s715_s12, %s901_s12  }
   0x4   : > { %s740_s18 = sadd.s32 1, %s690_s15   ;;  %s91_s19 = sadd.s32 1, %s686_s14 }
   0x5   : > { %s88_s20 = ssub.s32 %s690_s15, %s740_s18  ;;  %p101_p0 = scmp.ne.s32.totalorder %s686_s14, %s682_s13 }
   0x6   : > { %p89_p1 = scmp.eq.s32.totalorder %s88_s20, 0  ;;  %p102_p2 = scmp.eq.s32.totalorder %s736_s16, 1 }
   0x7   : > { %p107_p3 = scmp.ne.s32.totalorder %s682_s13, %s678_s12  ;;  %p108_p4 = scmp.eq.s32.totalorder %s515_s17, 1 }
   0x8   : > { %s751_s21 = scalar_select %p89_p1, %s686_s14, %s91_s19  }
   0x9   : > { %p753_p5 = por %p102_p2, %p101_p0  ;;  %p757_p6 = por %p108_p4, %p107_p3 }
   0xa   : > { %p518_p7 = scmp.ge.s32.totalorder %s690_s15, 1  ;;  %p141_p8 = scmp.lt.s32.totalorder %s690_s15, 3 }
   0xc   : > { %p142_p9 = pnand %p518_p7, %p141_p8 }
   0xd   : > { %v180_v0 = vld [vmem:[%s896_s1] sm:$0xff] (!%p142_p9)  ;;  %v181_v1 = vld [vmem:[%s896_s1 + $0x8] sm:$0xff] (!%p142_p9)  ;;  %s520_s28 = sshll.u32 (!%p142_p9), %s736_s16, 3  ;;  %vm187_vm0 = vcmask (!%p142_p9), 130048   ;;  %s162_s8 = sand.u32 (!%p142_p9), 1, %s682_s13  }
   0xe   : > { %145 = sbr.rel (%p142_p9) target bundleno = 582 (0x246), region = 32  ;;  %v565_v2 = vpack.c.bf16 (!%p142_p9), %v181_v1, %v180_v0  ;;  %p166_p10 = scmp.lt.s32.totalorder (!%p142_p9), %s520_s28, 15  ;;  %v522_v11 = vld [vmem:[%s897_s2] ss:$0 sm:$0xff] (!%p142_p9) }
   0xf   : > { %s519_s11 = sshll.u32 (!%p142_p9), %s162_s8, 6  ;;  %s538_s24 = sshll.u32 (!%p142_p9), %s736_s16, 10 }
  0x10   : > { %566 = vmatprep.subr.bf16.mxu0 (!%p142_p9), %v565_v2  ;;  %569 = vmatprep.subr.bf16.mxu1 (!%p142_p9), %v565_v2  ;;  %s828_s20 = scalar_lea.vmem (!%p142_p9), [#allocation2], %s519_s11  ;;  %s692_s30 = smov (!%p142_p9), [#allocation2]  }
  0x11   : > { %568 = vmatpush3.bf16.msra.mxu0 (!%p142_p9), %v565_v2  ;;  %570 = vmatpush3.bf16.msra.mxu1 (!%p142_p9), %v565_v2  ;;  %s453_s25 = sshll.u32 (!%p142_p9), %s828_s20, 4  ;;  %s632_s4 = sshll.u32 (!%p142_p9), %s692_s30, 4  ;;  %s849_s25 = int_to_ptr.vmem [resolvable:$true] %s453_s25  ;;  %s633_s4 = int_to_ptr.vmem [resolvable:$false] %s632_s4 }
  0x12   : > { %s628_s16 = scalar_lea.vmem (!%p142_p9), %s849_s25, 1024  ;;  %p635_p0 = scmp.lt.s32.totalorder (!%p142_p9), %s849_s25, %s633_s4 }
  0x13   : > { %p629_p11 = scmp.ne.s32.totalorder (!%p142_p9), %s849_s25, %s628_s16 }
  0x15   : > { %s906_s28 = smov (!%p166_p10, %s520_s28), 15  ;;  %p630_p12 = pnand %p629_p11, %p753_p5 }
  0x16   : > { %s521_s29 = sshll.u32 %s906_s28, 3  ;;  %s847_s28 = scalar_lea.hbm %s898_s3, %s538_s24 }
  0x17   : > { %s169_s5 = scalar_lea.vmem %s895_s0, %s521_s29  ;;  %s854_s29 = scalar_lea.sflag [#allocation3], %s162_s8 }
  0x18   : > { %v172_v3 = vld [vmem:[%s169_s5] sm:$0xff]  ;;  %v173_v5 = vld [vmem:[%s169_s5 + $0x8] sm:$0xff]  ;;  %v174_v7 = vld [vmem:[%s169_s5 + $0x10] sm:$0xff]  ;;  %p631_p13 = pneg %p630_p12 }
  0x19   : > { %v176_v4 = vld [vmem:[%s169_s5 + $0x20] sm:$0xff]  ;;  %553 = vmatprep.mubr.msk.f32.mxu0 %vm187_vm0, %v172_v3  ;;  %v177_v6 = vld [vmem:[%s169_s5 + $0x28] sm:$0xff]  ;;  %v178_v8 = vld [vmem:[%s169_s5 + $0x30] sm:$0xff] }
  0x1a   : > { %559 = vmatprep.mubr.msk.f32.mxu1 %vm187_vm0, %v176_v4  ;;  %554 = vmatmul.mubr.msk.f32.vlgmr.msra.gmra.mrb[0].mxu0 %vm187_vm0, %v173_v5  ;;  %v175_v9 = vld [vmem:[%s169_s5 + $0x18] sm:$0xff] }
  0x1b   : > { %560 = vmatmul.mubr.msk.f32.vlgmr.msra.gmra.mrb[0].mxu1 %vm187_vm0, %v177_v6  ;;  %556 = vmatprep.mubr.msk.f32.mxu0 %vm187_vm0, %v174_v7  ;;  %v179_v10 = vld [vmem:[%s169_s5 + $0x38] sm:$0xff]  ;;  %s634_s5 = scalar_lea.vmem %s633_s4, 2048 }
  0x1c   : > { %562 = vmatprep.mubr.msk.f32.mxu1 %vm187_vm0, %v178_v8  ;;  %p636_p1 = scmp.lt.s32.totalorder %s634_s5, %s628_s16 }
  0x1e   : > { %557 = vmatmul.mubr.msk.f32.gmra.mrb[2].mxu0 %vm187_vm0, %v175_v9  ;;  %p637_p2 = por %p636_p1, %p635_p0 }
  0x1f   : > { %563 = vmatmul.mubr.msk.f32.gmra.mrb[2].mxu1 %vm187_vm0, %v179_v10 }
  0x20   : > { %p638_p3 = pnand %p637_p2, %p631_p13 }
  0xed   : > { %v555_v12 = vpop.f32.mrb[0].mxu0 }
  0xee   : > { %v561_v13 = vpop.f32.mrb[0].mxu1  ;;  %v284_v14 = vadd.f32 %v555_v12, %v522_v11  ;;  %v278_v16 = vpop.f32.mrb[1].mxu0 }
  0xef   : > { %v304_v15 = vadd.f32 %v561_v13, %v522_v11  ;;  %v298_v17 = vpop.f32.mrb[1].mxu1  ;;  %v279_v20 = vadd.f32 %v522_v11, %v278_v16  ;;  %v531_v16 = vld [vmem:[%s897_s2 + $0x1] ss:$0 sm:$0xff] }
  0xf0   : > { %319 = vadd.xlane.f32.xlu0 %v284_v14  ;;  %v299_v25 = vadd.f32 %v522_v11, %v298_v17 }
  0xf1   : > { %327 = vadd.xlane.f32.xlu1 %v304_v15  ;;  %v558_v18 = vpop.f32.mrb[2].mxu0 }
  0xf2   : > { %v564_v19 = vpop.f32.mrb[2].mxu1  ;;  %v294_v21 = vadd.f32 %v558_v18, %v522_v11  ;;  %v288_v22 = vpop.f32.mrb[3].mxu0 }
  0xf3   : > { %v308_v23 = vpop.f32.mrb[3].mxu1  ;;  %v289_v24 = vadd.f32 %v522_v11, %v288_v22  ;;  %v314_v26 = vadd.f32 %v564_v19, %v522_v11 }
  0xf4   : > { %317 = vadd.xlane.f32.xlu0 %v279_v20  ;;  %v309_v27 = vadd.f32 %v522_v11, %v308_v23 }
  0xf5   : > { %323 = vadd.xlane.f32.xlu1 %v294_v21 }
  0xf8   : > { %325 = vadd.xlane.f32.xlu0 %v299_v25 }
  0xf9   : > { %321 = vadd.xlane.f32.xlu1 %v289_v24 }
  0xfc   : > { %329 = vadd.xlane.f32.xlu0 %v309_v27 }
  0xfd   : > { %331 = vadd.xlane.f32.xlu1 %v314_v26 }
 0x17d   : > { %v320_v29 = vpop.xlane.xlu0 %319 }
 0x17e   : > { %v328_v28 = vpop.xlane.xlu1 %327  ;;  %v334_v31 = vmul.f32 0.0078125, %v320_v29 }
 0x17f   : > { %v338_v30 = vmul.f32 0.0078125, %v328_v28 }
 0x180   : > { %v784_v32 = vsub.f32 %v284_v14, %v334_v31 }
 0x181   : > { %v318_v34 = vpop.xlane.xlu0 %317  ;;  %v786_v35 = vsub.f32 %v304_v15, %v338_v30 }
 0x182   : > { %v324_v33 = vpop.xlane.xlu1 %323  ;;  %v333_v37 = vmul.f32 0.0078125, %v318_v34  ;;  %v350_v38 = vmul.f32 %v784_v32, %v784_v32 }
 0x183   : > { %v336_v36 = vmul.f32 0.0078125, %v324_v33  ;;  %v354_v45 = vmul.f32 %v786_v35, %v786_v35 }
 0x184   : > { %v790_v39 = vsub.f32 %v279_v20, %v333_v37  ;;  %359 = vadd.xlane.f32.xlu1 %v350_v38 }
 0x185   : > { %v792_v40 = vsub.f32 %v294_v21, %v336_v36  ;;  %v326_v42 = vpop.xlane.xlu0 %325  ;;  %v532_v21 = vld [vmem:[%s897_s2 + $0x2] ss:$0 sm:$0xff] }
 0x186   : > { %v322_v41 = vpop.xlane.xlu1 %321  ;;  %v337_v44 = vmul.f32 0.0078125, %v326_v42  ;;  %v349_v46 = vmul.f32 %v790_v39, %v790_v39 }
 0x187   : > { %v335_v43 = vmul.f32 0.0078125, %v322_v41  ;;  %v352_v50 = vmul.f32 %v792_v40, %v792_v40 }
 0x188   : > { %v798_v47 = vsub.f32 %v299_v25, %v337_v44  ;;  %367 = vadd.xlane.f32.xlu1 %v354_v45  ;;  %357 = vadd.xlane.f32.xlu0 %v349_v46 }
 0x189   : > { %v330_v49 = vpop.xlane.xlu0 %329  ;;  %v802_v51 = vsub.f32 %v289_v24, %v335_v43 }
 0x18a   : > { %v332_v48 = vpop.xlane.xlu1 %331  ;;  %v339_v53 = vmul.f32 0.0078125, %v330_v49  ;;  %v353_v54 = vmul.f32 %v798_v47, %v798_v47 }
 0x18b   : > { %v340_v52 = vmul.f32 0.0078125, %v332_v48  ;;  %v351_v58 = vmul.f32 %v802_v51, %v802_v51 }
 0x18c   : > { %363 = vadd.xlane.f32.xlu1 %v352_v50  ;;  %365 = vadd.xlane.f32.xlu0 %v353_v54  ;;  %v808_v56 = vsub.f32 %v309_v27, %v339_v53 }
 0x18d   : > { %v806_v55 = vsub.f32 %v314_v26, %v340_v52 }
 0x18e   : > { %v355_v59 = vmul.f32 %v808_v56, %v808_v56 }
 0x18f   : > { %v356_v57 = vmul.f32 %v806_v55, %v806_v55 }
 0x190   : > { %361 = vadd.xlane.f32.xlu0 %v351_v58 }
 0x191   : > { %371 = vadd.xlane.f32.xlu1 %v356_v57 }
 0x194   : > { %369 = vadd.xlane.f32.xlu0 %v355_v59 }
 0x211   : > { %v360_v60 = vpop.xlane.xlu1 %359 }
 0x212   : > { %v374_v61 = vmul.f32 0.0078125, %v360_v60 }
 0x214   : > { %v382_v62 = vadd.f32 1e-05, %v374_v61 }
 0x215   : > { %v368_v63 = vpop.xlane.xlu1 %367  ;;  %v358_v0 = vpop.xlane.xlu0 %357 }
 0x216   : > { %612 = vrsqrt.f32 %v382_v62  ;;  %v378_v1 = vmul.f32 0.0078125, %v368_v63  ;;  %v373_v2 = vmul.f32 0.0078125, %v358_v0 }
 0x218   : > { %v386_v3 = vadd.f32 1e-05, %v378_v1  ;;  %v381_v4 = vadd.f32 1e-05, %v373_v2 }
 0x219   : > { %v364_v5 = vpop.xlane.xlu1 %363  ;;  %v366_v6 = vpop.xlane.xlu0 %365 }
 0x21a   : > { %614 = vrsqrt.f32 %v386_v3  ;;  %v376_v7 = vmul.f32 0.0078125, %v364_v5  ;;  %v377_v8 = vmul.f32 0.0078125, %v366_v6 }
 0x21b   : > { %616 = vrsqrt.f32 %v381_v4 }
 0x21c   : > { %v384_v9 = vadd.f32 1e-05, %v376_v7  ;;  %v385_v10 = vadd.f32 1e-05, %v377_v8 }
 0x21d   : > { %v362_v12 = vpop.xlane.xlu0 %361 }
 0x21e   : > { %v372_v11 = vpop.xlane.xlu1 %371  ;;  %618 = vrsqrt.f32 %v384_v9  ;;  %v375_v14 = vmul.f32 0.0078125, %v362_v12 }
 0x21f   : > { %v380_v13 = vmul.f32 0.0078125, %v372_v11  ;;  %620 = vrsqrt.f32 %v385_v10 }
 0x220   : > { %v613_v15 = vpop.eup %612  ;;  %v383_v18 = vadd.f32 1e-05, %v375_v14 }
 0x221   : > { %v388_v17 = vadd.f32 1e-05, %v380_v13  ;;  %v398_v19 = vmul.f32 %v613_v15, %v784_v32  ;;  %v370_v20 = vpop.xlane.xlu0 %369 }
 0x222   : > { %v379_v22 = vmul.f32 0.0078125, %v370_v20 }
 0x223   : > { %622 = vrsqrt.f32 %v388_v17  ;;  %v411_v23 = vmul.f32 %v531_v16, %v398_v19 }
 0x224   : > { %624 = vrsqrt.f32 %v383_v18  ;;  %v615_v24 = vpop.eup %614  ;;  %v387_v25 = vadd.f32 1e-05, %v379_v22 }
 0x225   : > { %v617_v26 = vpop.eup %616  ;;  %v424_v27 = vadd.f32 %v532_v21, %v411_v23  ;;  %v402_v28 = vmul.f32 %v615_v24, %v786_v35 }
 0x226   : > { %v397_v29 = vmul.f32 %v617_v26, %v790_v39  ;;  %626 = vrsqrt.f32 %v387_v25 }
 0x227   : > { %432 = vst [vmem:[%s828_s20 + $0x8] sm:$0xff] %v424_v27  ;;  %v415_v30 = vmul.f32 %v531_v16, %v402_v28 }
 0x228   : > { %v619_v31 = vpop.eup %618  ;;  %v410_v32 = vmul.f32 %v531_v16, %v397_v29 }
 0x229   : > { %v621_v33 = vpop.eup %620  ;;  %v428_v34 = vadd.f32 %v532_v21, %v415_v30  ;;  %v400_v36 = vmul.f32 %v619_v31, %v792_v40 }
 0x22a   : > { %v423_v37 = vadd.f32 %v532_v21, %v410_v32  ;;  %v401_v35 = vmul.f32 %v621_v33, %v798_v47 }
 0x22b   : > { %436 = vst [vmem:[%s828_s20 + $0x28] sm:$0xff] %v428_v34  ;;  %v413_v38 = vmul.f32 %v531_v16, %v400_v36 }
 0x22c   : > { %431 = vst [vmem:[%s828_s20] sm:$0xff] %v423_v37  ;;  %v414_v41 = vmul.f32 %v531_v16, %v401_v35 }
 0x22d   : > { %v623_v39 = vpop.eup %622  ;;  %v426_v43 = vadd.f32 %v532_v21, %v413_v38 }
 0x22e   : > { %v625_v42 = vpop.eup %624  ;;  %v404_v44 = vmul.f32 %v623_v39, %v806_v55  ;;  %v427_v45 = vadd.f32 %v532_v21, %v414_v41 }
 0x22f   : > { %v399_v40 = vmul.f32 %v625_v42, %v802_v51  ;;  %434 = vst [vmem:[%s828_s20 + $0x18] sm:$0xff] %v426_v43 }
 0x230   : > { %v417_v46 = vmul.f32 %v531_v16, %v404_v44  ;;  %v627_v47 = vpop.eup %626  ;;  %435 = vst [vmem:[%s828_s20 + $0x20] sm:$0xff] %v427_v45 }
 0x231   : > { %v412_v48 = vmul.f32 %v531_v16, %v399_v40  ;;  %v403_v50 = vmul.f32 %v627_v47, %v808_v56 }
 0x232   : > { %v430_v49 = vadd.f32 %v532_v21, %v417_v46 }
 0x233   : > { %v425_v52 = vadd.f32 %v532_v21, %v412_v48  ;;  %v416_v53 = vmul.f32 %v531_v16, %v403_v50 }
 0x234   : > { %438 = vst [vmem:[%s828_s20 + $0x38] sm:$0xff] %v430_v49 }
 0x235   : > { %433 = vst [vmem:[%s828_s20 + $0x10] sm:$0xff] %v425_v52  ;;  %v429_v51 = vadd.f32 %v532_v21, %v416_v53 }
 0x237   : > { %437 = vst [vmem:[%s828_s20 + $0x30] sm:$0xff] %v429_v51 }
 0x238   : > { %641 = shalt.err (!%p638_p3)
}
 0x239   : > { %s642_s6 = scalar_lea.hbm %s847_s28, 1024  ;;  %s646_s9 = scalar_lea.hbm %s898_s3, 2048 }
 0x23a   : > { %p643_p4 = scmp.ne.s32.totalorder %s847_s28, %s642_s6  ;;  %p647_p9 = scmp.lt.u32.totalorder %s847_s28, %s898_s3 }
 0x23b   : > { %p648_p10 = scmp.lt.u32.totalorder %s646_s9, %s642_s6  ;;  %p650_p12 = scmp.lt.u32.totalorder %s642_s6, %s847_s28 }
 0x23c   : > { %p644_p7 = pnand %p643_p4, %p753_p5 }
 0x23d   : > { %p649_p11 = por %p648_p10, %p647_p9 }
 0x23e   : > { %p645_p8 = pneg %p644_p7 }
 0x23f   : > { %p651_p13 = por %p650_p12, %p649_p11 }
 0x241   : > { %p652_p0 = pnand %p651_p13, %p645_p8 }
 0x243   : > { %655 = shalt.err (!%p652_p0)
}
 0x244   : > { %s693_s17 = smov 128   ;;  %s694_s19 = smov 8  }
 0x245   : > { %571 = dma.vmem_to_hbm [thread:$0]  (%p753_p5), %s849_s25, 1024, %s847_s28, %s854_s29, %s693_s17, %s693_s17, %s694_s19  }
 0x246 PF: > { %p577_p1 = scmp.ge.s32.totalorder %s690_s15, 2  ;;  %s468_s20 = sand.u32 1, %s678_s12  }
 0x247   : > { %s469_s24 = scalar_lea.sflag [#allocation3], %s468_s20 }
 0x248   : > { %p574_p2 = pnand %p577_p1, %p757_p6 }
 0x24a   : > { %673 = dma.done.wait (!%p574_p2), %s469_s24, 1024  }
 0x24b   : > { %675 = vsyncadd (!%p574_p2), %s469_s24, 4294966272  ;;  %p13_p3 = scmp.ge.s32.totalorder %s740_s18, 4   ;;  %s901_s12 = smov %s682_s13 }
 0x24c   : > { %s902_s13 = smov %s686_s14  ;;  %s903_s14 = smov %s751_s21 }
 0x24d   : > { %s904_s15 = smov %s740_s18  ;;  %15 = sbr.rel (!%p13_p3) target bundleno = 3 (0x3), region = 67 }
 0x254   :  { %474 = vsyncpa [#allocation3], 1 }
 0x255   :  { %476 = vsyncpa [#allocation3 + $0x1], 1 }

</bundles_post_ra>
